<compile_context>
chip_gen: v6e
topology: v6e:2x2x1
jax: 0.10.0
libtpu: 0.0.40
codegen_flags: <defaults>
</compile_context>

<pallas_src>
import jax
import jax.numpy as jnp
import numpy as np
from jax.experimental import pallas as pl
from jax.experimental.pallas import tpu as pltpu

# -------------------- model hyperparameters (module defaults) -----------------
BATCH = 2
SEQ = 8
INPUT_DIM = 16
HIDDEN_DIM = 16      # FactorVAE default hidden_dim=16
LATENT_DIM = 1       # FactorVAE default latent_dim=1
OUTPUT_DIM = 1       # FactorVAE default output_dim=1

N_PAD = 8                               # rows padded to one sublane group
OUT_PAD = 128                           # lane-dense output width (one vreg row)
IN_LANES = INPUT_DIM + HIDDEN_DIM       # x lanes + lane-broadcast eps lanes

# --- packed parameter slab layout (rows; each matrix 8-row aligned) ------------
ROW_W1 = 0     # (INPUT_DIM, HIDDEN_DIM)        lanes [0 : H)
ROW_WML = 16   # (HIDDEN_DIM, 2*HIDDEN_DIM)     lanes [0 : 2H)  (mu|logvar cols replicated)
ROW_WD2 = 32   # (HIDDEN_DIM, OUT_PAD)          lanes [0 : OUT_PAD)
ROW_B1 = 48    # (1, HIDDEN_DIM)
ROW_BML = 49   # (1, 2*HIDDEN_DIM)
ROW_WD1 = 50   # (1, HIDDEN_DIM)  decoder fc1 weight row (latent_dim == 1)
ROW_BD1 = 51   # (1, HIDDEN_DIM)
ROW_BD2 = 52   # (1, OUT_PAD)
SLAB_ROWS = 56


# ------------------------------- Pallas kernel ---------------------------------
def factorvae_kernel(x_ref, p_ref, o_ref):
    xin = x_ref[...]                                   # (N_PAD, IN_LANES)
    x = xin[:, :INPUT_DIM]                             # (N_PAD, Din)
    eps = xin[:, INPUT_DIM:IN_LANES]                   # (N_PAD, H) lane-broadcast eps

    # Static slices of the single packed parameter slab (no extra DMAs).
    w1 = p_ref[ROW_W1:ROW_W1 + INPUT_DIM, :HIDDEN_DIM]
    wml = p_ref[ROW_WML:ROW_WML + HIDDEN_DIM, :2 * HIDDEN_DIM]
    wd2 = p_ref[ROW_WD2:ROW_WD2 + HIDDEN_DIM, :OUT_PAD]
    b1 = p_ref[ROW_B1:ROW_B1 + 1, :HIDDEN_DIM]
    bml = p_ref[ROW_BML:ROW_BML + 1, :2 * HIDDEN_DIM]
    wd1 = p_ref[ROW_WD1:ROW_WD1 + 1, :HIDDEN_DIM]
    bd1 = p_ref[ROW_BD1:ROW_BD1 + 1, :HIDDEN_DIM]
    bd2 = p_ref[ROW_BD2:ROW_BD2 + 1, :OUT_PAD]

    # Encoder fc1 + relu
    h = jnp.maximum(jnp.dot(x, w1, preferred_element_type=jnp.float32) + b1, 0.0)

    # Fused mu/logvar head; columns are replicated across H lanes so mu/logvar/z
    # are already (N, H)-wide -> pure full-lane VPU work downstream.
    ml = jnp.dot(h, wml, preferred_element_type=jnp.float32) + bml
    mu = ml[:, :HIDDEN_DIM]                            # (N_PAD, H) replicated
    logvar = ml[:, HIDDEN_DIM:2 * HIDDEN_DIM]          # (N_PAD, H) replicated

    # Reparameterize (eps already lane-broadcast in the wrapper).
    z = mu + eps * jnp.exp(0.5 * logvar)               # (N_PAD, H)

    # Decoder fc1 (latent_dim == 1 -> rank-1) + relu: broadcasted VPU multiply.
    d = jnp.maximum(z * wd1 + bd1, 0.0)                # (N_PAD, H)

    # Decoder fc2 + sigmoid, zero-padded to 128 lanes -> one unmasked (8,128) vst.
    logits = jnp.dot(d, wd2, preferred_element_type=jnp.float32) + bd2
    o_ref[...] = jax.nn.sigmoid(logits)                # (N_PAD, OUT_PAD)


# --------------------------------- wrapper --------------------------------------
@jax.jit
def factorvae_forward(x, eps, param_slab):
    B = x.shape[0]

    # Only the last timestep contributes to the output -> drop 7/8 of the work.
    x_last = x[:, -1, :]                                       # (B, Din)
    eps_last = eps[:, -1, :]                                   # (B, L)
    eps_b = jnp.broadcast_to(eps_last, (B, HIDDEN_DIM))        # lane-broadcast

    # Single input slab (rows padded to 8): [ x | eps_broadcast ].
    xin = jnp.zeros((N_PAD, IN_LANES), jnp.float32)
    xin = xin.at[:B, :INPUT_DIM].set(x_last)
    xin = xin.at[:B, INPUT_DIM:].set(eps_b)

    vmem = pl.BlockSpec(memory_space=pltpu.MemorySpace.VMEM)

    out = pl.pallas_call(
        factorvae_kernel,
        out_shape=jax.ShapeDtypeStruct((N_PAD, OUT_PAD), jnp.float32),
        in_specs=[vmem, vmem],          # whole arrays in VMEM, no grid/pipeline
        out_specs=vmem,
    )(xin, param_slab)

    return out[:B, :OUTPUT_DIM]                                # (B, OUTPUT_DIM)


def build_param_slab(w1, b1, wmu, bmu, wlv, blv, wd1, bd1, wd2, bd2):
    """Pack all parameters (already transposed for right-matmul) into one slab."""
    H = HIDDEN_DIM
    wmu_rep = jnp.tile(wmu, (1, H))                            # (H, H)
    wlv_rep = jnp.tile(wlv, (1, H))                            # (H, H)
    bmu_rep = jnp.tile(bmu, (1, H))                            # (1, H)
    blv_rep = jnp.tile(blv, (1, H))                            # (1, H)

    slab = jnp.zeros((SLAB_ROWS, OUT_PAD), jnp.float32)
    slab = slab.at[ROW_W1:ROW_W1 + INPUT_DIM, :H].set(w1)
    slab = slab.at[ROW_WML:ROW_WML + H, :H].set(wmu_rep)
    slab = slab.at[ROW_WML:ROW_WML + H, H:2 * H].set(wlv_rep)
    slab = slab.at[ROW_WD2:ROW_WD2 + H, :OUTPUT_DIM].set(wd2)
    slab = slab.at[ROW_B1, :H].set(b1[0])
    slab = slab.at[ROW_BML, :H].set(bmu_rep[0])
    slab = slab.at[ROW_BML, H:2 * H].set(blv_rep[0])
    slab = slab.at[ROW_WD1, :H].set(wd1[0])
    slab = slab.at[ROW_BD1, :H].set(bd1[0])
    slab = slab.at[ROW_BD2, :OUTPUT_DIM].set(bd2[0])
    return slab


# --------------------------- pure-JAX reference ----------------------------------
def factorvae_reference(x, eps, raw_params):
    (w1, b1, wmu, bmu, wlv, blv, wd1, bd1, wd2, bd2) = raw_params
    h = jnp.maximum(x @ w1 + b1, 0.0)
    mu = h @ wmu + bmu
    logvar = h @ wlv + blv
    z = mu + eps * jnp.exp(0.5 * logvar)
    d = jnp.maximum(z @ wd1 + bd1, 0.0)
    x_recon = jax.nn.sigmoid(d @ wd2 + bd2)
    return x_recon[:, -1, :]


# ------------------------------------ main ----------------------------------------
if __name__ == "__main__":
    key = jax.random.PRNGKey(0)
    ks = jax.random.split(key, 12)

    def init(k, shape, scale=0.1):
        return (scale * jax.random.normal(k, shape)).astype(jnp.float32)

    # Parameters, already transposed for right-matmul (y = x @ W + b).
    w1 = init(ks[0], (INPUT_DIM, HIDDEN_DIM))
    b1 = init(ks[1], (1, HIDDEN_DIM))
    wmu = init(ks[2], (HIDDEN_DIM, LATENT_DIM))
    bmu = init(ks[3], (1, LATENT_DIM))
    wlv = init(ks[4], (HIDDEN_DIM, LATENT_DIM))
    blv = init(ks[5], (1, LATENT_DIM))
    wd1 = init(ks[6], (LATENT_DIM, HIDDEN_DIM))
    bd1 = init(ks[7], (1, HIDDEN_DIM))
    wd2 = init(ks[8], (HIDDEN_DIM, OUTPUT_DIM))
    bd2 = init(ks[9], (1, OUTPUT_DIM))

    x = jax.random.normal(ks[10], (BATCH, SEQ, INPUT_DIM), dtype=jnp.float32)
    # TODO(synk): torch.randn_like noise is sampled host-side (deterministic) and
    # passed in; pltpu.stateful_normal could generate it in-kernel if desired.
    eps = jax.random.normal(ks[11], (BATCH, SEQ, LATENT_DIM), dtype=jnp.float32)

    param_slab = build_param_slab(w1, b1, wmu, bmu, wlv, blv, wd1, bd1, wd2, bd2)

    out = factorvae_forward(x, eps, param_slab)
    out = jax.block_until_ready(out)

    ref = factorvae_reference(x, eps, (w1, b1, wmu, bmu, wlv, blv, wd1, bd1, wd2, bd2))
    ref = jax.block_until_ready(ref)

    assert out.shape == (BATCH, OUTPUT_DIM)
    np.testing.assert_allclose(np.asarray(out), np.asarray(ref), rtol=1e-4, atol=1e-5)

    print("KERNEL_OK")
</pallas_src>

<mosaic_0001>
module attributes {stable_mosaic.version = 11 : i64} {
  func.func @factorvae_kernel(%arg0: memref<8x32xf32, #tpu.memory_space<vmem>>, %arg1: memref<56x128xf32, #tpu.memory_space<vmem>>, %arg2: memref<8x128xf32, #tpu.memory_space<vmem>>) attributes {dimension_semantics = [], scalar_prefetch = 0 : i64, scratch_operands = 0 : i64, tpu.core_type = #tpu.core_type<tc>} {
    %c0 = arith.constant 0 : index
    %c0_0 = arith.constant 0 : index
    %0 = vector.load %arg0[%c0, %c0_0] : memref<8x32xf32, #tpu.memory_space<vmem>>, vector<8x32xf32>
    %1 = vector.extract_strided_slice %0 {offsets = [0, 0], sizes = [8, 16], strides = [1, 1]} : vector<8x32xf32> to vector<8x16xf32>
    %2 = vector.extract_strided_slice %0 {offsets = [0, 16], sizes = [8, 16], strides = [1, 1]} : vector<8x32xf32> to vector<8x16xf32>
    %c0_1 = arith.constant 0 : index
    %c0_2 = arith.constant 0 : index
    %3 = vector.load %arg1[%c0_1, %c0_2] : memref<56x128xf32, #tpu.memory_space<vmem>>, vector<16x16xf32>
    %c16 = arith.constant 16 : index
    %c0_3 = arith.constant 0 : index
    %4 = vector.load %arg1[%c16, %c0_3] : memref<56x128xf32, #tpu.memory_space<vmem>>, vector<16x32xf32>
    %c32 = arith.constant 32 : index
    %c0_4 = arith.constant 0 : index
    %5 = vector.load %arg1[%c32, %c0_4] : memref<56x128xf32, #tpu.memory_space<vmem>>, vector<16x128xf32>
    %c48 = arith.constant 48 : index
    %c0_5 = arith.constant 0 : index
    %6 = vector.load %arg1[%c48, %c0_5] : memref<56x128xf32, #tpu.memory_space<vmem>>, vector<1x16xf32>
    %c49 = arith.constant 49 : index
    %c0_6 = arith.constant 0 : index
    %7 = vector.load %arg1[%c49, %c0_6] : memref<56x128xf32, #tpu.memory_space<vmem>>, vector<1x32xf32>
    %c50 = arith.constant 50 : index
    %c0_7 = arith.constant 0 : index
    %8 = vector.load %arg1[%c50, %c0_7] : memref<56x128xf32, #tpu.memory_space<vmem>>, vector<1x16xf32>
    %c51 = arith.constant 51 : index
    %c0_8 = arith.constant 0 : index
    %9 = vector.load %arg1[%c51, %c0_8] : memref<56x128xf32, #tpu.memory_space<vmem>>, vector<1x16xf32>
    %c52 = arith.constant 52 : index
    %c0_9 = arith.constant 0 : index
    %10 = vector.load %arg1[%c52, %c0_9] : memref<56x128xf32, #tpu.memory_space<vmem>>, vector<1x128xf32>
    %cst = arith.constant dense<0.000000e+00> : vector<8x16xf32>
    %11 = tpu.matmul %1, %3, %cst {dimension_numbers = #tpu.dot_dimension_numbers<[1], [0], [0], [1], [0, 0, 1, 1], [], []>} : vector<8x16xf32>, vector<16x16xf32>, vector<8x16xf32> -> vector<8x16xf32>
    %12 = vector.broadcast %6 : vector<1x16xf32> to vector<8x16xf32>
    %13 = arith.addf %11, %12 : vector<8x16xf32>
    %cst_10 = arith.constant 0.000000e+00 : f32
    %14 = vector.broadcast %cst_10 : f32 to vector<8x16xf32>
    %15 = arith.maximumf %13, %14 : vector<8x16xf32>
    %cst_11 = arith.constant dense<0.000000e+00> : vector<8x32xf32>
    %16 = tpu.matmul %15, %4, %cst_11 {dimension_numbers = #tpu.dot_dimension_numbers<[1], [0], [0], [1], [0, 0, 1, 1], [], []>} : vector<8x16xf32>, vector<16x32xf32>, vector<8x32xf32> -> vector<8x32xf32>
    %17 = vector.broadcast %7 : vector<1x32xf32> to vector<8x32xf32>
    %18 = arith.addf %16, %17 : vector<8x32xf32>
    %19 = vector.extract_strided_slice %18 {offsets = [0, 0], sizes = [8, 16], strides = [1, 1]} : vector<8x32xf32> to vector<8x16xf32>
    %20 = vector.extract_strided_slice %18 {offsets = [0, 16], sizes = [8, 16], strides = [1, 1]} : vector<8x32xf32> to vector<8x16xf32>
    %cst_12 = arith.constant 5.000000e-01 : f32
    %21 = vector.broadcast %cst_12 : f32 to vector<8x16xf32>
    %22 = arith.mulf %21, %20 : vector<8x16xf32>
    %23 = math.exp %22 : vector<8x16xf32>
    %24 = arith.mulf %2, %23 : vector<8x16xf32>
    %25 = arith.addf %19, %24 : vector<8x16xf32>
    %26 = vector.broadcast %8 : vector<1x16xf32> to vector<8x16xf32>
    %27 = arith.mulf %25, %26 : vector<8x16xf32>
    %28 = vector.broadcast %9 : vector<1x16xf32> to vector<8x16xf32>
    %29 = arith.addf %27, %28 : vector<8x16xf32>
    %cst_13 = arith.constant 0.000000e+00 : f32
    %30 = vector.broadcast %cst_13 : f32 to vector<8x16xf32>
    %31 = arith.maximumf %29, %30 : vector<8x16xf32>
    %cst_14 = arith.constant dense<0.000000e+00> : vector<8x128xf32>
    %32 = tpu.matmul %31, %5, %cst_14 {dimension_numbers = #tpu.dot_dimension_numbers<[1], [0], [0], [1], [0, 0, 1, 1], [], []>} : vector<8x16xf32>, vector<16x128xf32>, vector<8x128xf32> -> vector<8x128xf32>
    %33 = vector.broadcast %10 : vector<1x128xf32> to vector<8x128xf32>
    %34 = arith.addf %32, %33 : vector<8x128xf32>
    %35 = arith.negf %34 : vector<8x128xf32>
    %36 = math.exp %35 : vector<8x128xf32>
    %cst_15 = arith.constant 1.000000e+00 : f32
    %37 = vector.broadcast %cst_15 : f32 to vector<8x128xf32>
    %38 = arith.addf %37, %36 : vector<8x128xf32>
    %39 = arith.divf %37, %38 : vector<8x128xf32>
    %c0_16 = arith.constant 0 : index
    %c0_17 = arith.constant 0 : index
    %40 = vector.load %arg2[%c0_16, %c0_17] : memref<8x128xf32, #tpu.memory_space<vmem>>, vector<8x128xf32>
    tpu.vector_store %arg2[%c0_16, %c0_17], %39 {strides = array<i32>} : memref<8x128xf32, #tpu.memory_space<vmem>>, vector<8x128xf32>,
    return
  }
}

</mosaic_0001>

<bundles_post_ra>
// kernel: factorvae_forward.1
= control target key start
LH: loop header
LB: loop body
LE: loop exit
PB: predicated region body
PF: predicated region fallthrough
CT: control target
= control target key end

     0   :  { %7 = vsyncpa [#allocation3], 0  ;;  %s375_s9 = smov [#allocation2]   ;;  %s408_s0 = inlined_call_operand.vmem [shape: f32[8,32], index: 0, kind: input, shape index: {}]   ;;  %s409_s1 = inlined_call_operand.hbm [shape: f32[56,128], index: 1, kind: input, shape index: {}]   ;;  %s410_s2 = inlined_call_operand.vmem [shape: f32[8,128], index: 2, kind: output, shape index: {}]  }
   0x1   :  { %s15_s10 = sshll.u32 %s375_s9, 4  ;;  %s16_s10 = int_to_ptr.vmem [resolvable:$true] %s15_s10 }
   0x2   :  { %s361_s11 = scalar_lea.vmem %s16_s10, 896  ;;  %p366_p1 = scmp.lt.s32.totalorder %s16_s10, %s16_s10 }
   0x3   :  { %p362_p0 = scmp.ne.s32.totalorder %s16_s10, %s361_s11  ;;  %p367_p2 = scmp.lt.s32.totalorder %s361_s11, %s361_s11 }
   0x5   :  { %p368_p3 = por %p367_p2, %p366_p1 }
   0x7   :  { %p369_p4 = pnand %p368_p3, %p362_p0 }
   0x9   :  { %372 = shalt.err (!%p369_p4)
}
   0xa   :  { %s376_s12 = smov 128   ;;  %s377_s13 = smov 8  }
   0xb   :  { %21 = dma.hbm_to_vmem [thread:$0]  %s409_s1, 896, %s16_s10, [#allocation3], %s376_s12, %s376_s12, %s377_s13  }
   0xc   :  { %373 = dma.done.wait [#allocation3], 896  }
   0xd   :  { %374 = vsyncadd [#allocation3], 4294966400  ;;  %v378_v0 = vmov 0.0   ;;  %vm379_vm0 = vmmov 0   ;;  %v27_v1 = vld [vmem:[#allocation2 + $0x8] sm:$0xff]  ;;  %v26_v2 = vld [vmem:[#allocation2] sm:$0xff] }
   0xe   :  { %320 = vmatprep.subr.mxu0 %v378_v0  ;;  %324 = vmatprep.mubr.msk.f32.mxu0 %vm379_vm0, %v378_v0  ;;  %v25_v3 = vld [vmem:[%s408_s0] sm:$0xff]  ;;  %vm41_vm1 = vcmask 130048   ;;  %v29_v4 = vld [vmem:[#allocation2 + $0x18] sm:$0xff]  ;;  %v28_v5 = vld [vmem:[#allocation2 + $0x10] sm:$0xff]  ;;  %s380_s0 = smov 112  }
   0xf   :  { %327 = vmatprep.subr.mxu1 %v378_v0  ;;  %331 = vmatprep.mubr.msk.f32.mxu1 %vm379_vm0, %v378_v0  ;;  %v302_v6 = vld [vmem:[#allocation2 + $0x30] ss:$0 sm:$0xff]  ;;  %v304_v11 = vld [vmem:[#allocation2 + $0x31] ss:$0 sm:$0xff]  ;;  %v31_v17 = vld [vmem:[#allocation2 + $0x28] sm:$0xff] }
  0x10   :  { %321 = vmatpush3.msra.mxu0 %v27_v1  ;;  %328 = vmatpush3.msra.mxu1 %v29_v4  ;;  %v30_v18 = vld [vmem:[#allocation2 + $0x20] sm:$0xff]  ;;  %v306_v21 = vld [vmem:[#allocation2 + $0x32] ss:$0 sm:$0xff]  ;;  %v307_v24 = vld [vmem:[#allocation2 + $0x33] ss:$0 sm:$0xff] }
  0x11   :  { %322 = vmatprep.subr.mxu0 %v378_v0  ;;  %329 = vmatprep.subr.mxu1 %v378_v0  ;;  %v308_v28 = vld [vmem:[#allocation2 + $0x34] ss:$0 sm:$0xff] }
  0x12   :  { %323 = vmatpush3.msra.mxu0 %v26_v2  ;;  %330 = vmatpush3.msra.mxu1 %v28_v5 }
  0x13   :  { %325 = vmatmul.mubr.msk.f32.vlgmr.msra.gmra.mxu0 %vm41_vm1, %v25_v3  ;;  %334 = vmatprep.subr.mxu0 %v378_v0 }
  0x14   :  { %338 = vmatprep.mubr.msk.f32.mxu0 %vm379_vm0, %v378_v0  ;;  %335 = vmatpush3.msra.mxu0 %v31_v17 }
  0x15   :  { %336 = vmatprep.subr.mxu0 %v378_v0 }
  0x16   :  { %337 = vmatpush3.msra.mxu0 %v30_v18 }
  0xd3   :  { %v111_v7 = vpop.f32.mrf.mxu0 }
  0xd4   :  { %v112_v8 = vadd.f32 %v302_v6, %v111_v7 }
  0xd5   :  { %v326_v9 = vpop.f32.mrf.mxu0 }
  0xd6   :  { %v115_v10 = vmax.f32 %v112_v8, 0.0 }
  0xd8   :  { %332 = vmatmul.mubr.msk.f32.vlgmr.msra.gmra.mxu1 %vm41_vm1, %v115_v10 }
 0x198   :  { %v189_v12 = vpop.f32.mrf.mxu1 }
 0x199   :  { %v190_v13 = vadd.f32 %v304_v11, %v189_v12 }
 0x19a   :  { %v333_v14 = vpop.f32.mrf.mxu1 }
 0x19b   :  { %v193_v15 = vmul.f32 0.5, %v190_v13 }
 0x19d   :  { %v194_v16 = vmul.f32 1.442695, %v193_v15 }
 0x19f   :  { %347 = vpow2.f32 %v194_v16 }
 0x1ac   :  { %v348_v19 = vpop.eup %347 }
 0x1ad   :  { %v196_v20 = vmul.f32 %v348_v19, %v25_v3 }
 0x1af   :  { %198 = vrot.lane.b32.xlu0 %v196_v20, %s380_s0 }
 0x221   :  { %v199_v22 = vpop.permute.xlu0 %198 }
 0x222   :  { %v201_v23 = vadd.f32 %v199_v22, %v190_v13 }
 0x224   :  { %v206_v25 = vmul.f32 %v306_v21, %v201_v23 }
 0x226   :  { %v211_v26 = vadd.f32 %v307_v24, %v206_v25 }
 0x228   :  { %v212_v27 = vmax.f32 %v211_v26, 0.0 }
 0x22a   :  { %339 = vmatmul.mubr.msk.f32.vlgmr.msra.gmra.mxu0 %vm41_vm1, %v212_v27 }
 0x2ea   :  { %v286_v29 = vpop.f32.mrf.mxu0 }
 0x2eb   :  { %v287_v30 = vadd.f32 %v308_v28, %v286_v29 }
 0x2ec   :  { %v340_v31 = vpop.f32.mrf.mxu0 }
 0x2ed   :  { %v310_v32 = vmul.f32 -1.442695, %v287_v30 }
 0x2ef   :  { %349 = vpow2.f32 %v310_v32 }
 0x2fc   :  { %v350_v33 = vpop.eup %349 }
 0x2fd   :  { %v293_v34 = vadd.f32 1.0, %v350_v33 }
 0x2ff   :  { %351 = vrcp.f32 %v293_v34 }
 0x30c   :  { %v352_v35 = vpop.eup %351 }
 0x30d   :  { %296 = vst [vmem:[%s410_s2] sm:$0xff] %v352_v35 }
 0x30e   :  { %301 = vsyncpa [#allocation3], 1 }

</bundles_post_ra>
